<compile_context>
chip_gen: v5e
topology: v5e:2x2
jax: 0.10.0
libtpu: 0.0.40
codegen_flags: <defaults>
</compile_context>

<pallas_src>
import math
import functools

import jax
import jax.numpy as jnp
from jax.experimental import pallas as pl
from jax.experimental.pallas import tpu as pltpu


def _round_up(x: int, m: int) -> int:
    return ((x + m - 1) // m) * m


def _encoder_kernel(x_ref, w1_ref, b1_ref, w2_ref, b2_ref, w3_ref, b3_ref, o_ref):
    # layer 1: (tb, D_in)bf16 @ (D_in, 512)bf16 -> f32 acc, +bias, ReLU (f32 on VPU)
    h1 = jnp.dot(x_ref[...], w1_ref[...], preferred_element_type=jnp.float32)
    h1 = jnp.maximum(h1 + b1_ref[...], 0.0)
    # layer 2: (tb, 512) @ (512, 256), bf16 operands, f32 accumulation
    h2 = jnp.dot(h1.astype(jnp.bfloat16), w2_ref[...],
                 preferred_element_type=jnp.float32)
    h2 = jnp.maximum(h2 + b2_ref[...], 0.0)
    # layer 3: (tb, 256) @ (256, code_pad), no activation; code_pad is a
    # multiple of 128 so the writeback uses full (unmasked) vector stores.
    h3 = jnp.dot(h2.astype(jnp.bfloat16), w3_ref[...],
                 preferred_element_type=jnp.float32)
    o_ref[...] = (h3 + b3_ref[...]).astype(o_ref.dtype)


@functools.partial(jax.jit, static_argnames=("block_b",))
def encoder_forward(x, w1, b1, w2, b2, w3, b3, *, block_b=256):
    orig_dtype = x.dtype
    B, d_in = x.shape
    code_dim = w3.shape[1]

    # --- pad layer-3 output width to a lane-dense multiple of 128 ---
    code_pad = _round_up(code_dim, 128)
    if code_pad != code_dim:
        w3 = jnp.pad(w3, ((0, 0), (0, code_pad - code_dim)))
        b3 = jnp.pad(b3, ((0, 0), (0, code_pad - code_dim)))

    # --- batch tile: multiple of 8 sublanes, clamped for small batches;
    #     pad B with zero rows so the grid divides evenly (sliced off below) ---
    bb = _round_up(min(block_b, _round_up(B, 8)), 8)
    B_pad = _round_up(B, bb)
    if B_pad != B:
        x = jnp.pad(x, ((0, B_pad - B), (0, 0)))

    # --- bf16 operands for the MXU; biases stay f32 ---
    xb = x.astype(jnp.bfloat16)
    w1b = w1.astype(jnp.bfloat16)
    w2b = w2.astype(jnp.bfloat16)
    w3b = w3.astype(jnp.bfloat16)

    grid = (B_pad // bb,)
    # weights / biases: full array as a single block, same for every grid step
    rep = lambda a: pl.BlockSpec(a.shape, lambda i: (0, 0))

    out = pl.pallas_call(
        _encoder_kernel,
        out_shape=jax.ShapeDtypeStruct((B_pad, code_pad), jnp.float32),
        grid_spec=pltpu.PrefetchScalarGridSpec(
            num_scalar_prefetch=0,
            grid=grid,
            in_specs=[
                pl.BlockSpec((bb, d_in), lambda i: (i, 0)),  # x batch tile
                rep(w1b), rep(b1),
                rep(w2b), rep(b2),
                rep(w3b), rep(b3),
            ],
            out_specs=pl.BlockSpec((bb, code_pad), lambda i: (i, 0)),
        ),
        compiler_params=pltpu.CompilerParams(
            dimension_semantics=("parallel",),  # shards batch tiles across TCs (v7x)
        ),
    )(xb, w1b, b1, w2b, b2, w3b, b3)

    # slice off batch padding and the lane padding of the last layer
    return out[:B, :code_dim].astype(orig_dtype)


def xavier_uniform_relu(key, fan_in, fan_out, dtype=jnp.float32):
    """Xavier-uniform with gain = calculate_gain('relu') = sqrt(2), stored (in, out)."""
    gain = math.sqrt(2.0)
    bound = gain * math.sqrt(6.0 / (fan_in + fan_out))
    # torch initializes weight of shape (out, in); we store the transpose (in, out),
    # which is the same iid-uniform distribution, so semantics are preserved.
    return jax.random.uniform(key, (fan_in, fan_out), dtype, minval=-bound, maxval=bound)


def make_encoder_params(key, input_dim, code_dim, dtype=jnp.float32):
    k1, k2, k3 = jax.random.split(key, 3)
    w1 = xavier_uniform_relu(k1, input_dim, 512, dtype)
    b1 = jnp.zeros((1, 512), dtype)
    w2 = xavier_uniform_relu(k2, 512, 256, dtype)
    b2 = jnp.zeros((1, 256), dtype)
    w3 = xavier_uniform_relu(k3, 256, code_dim, dtype)
    b3 = jnp.zeros((1, code_dim), dtype)
    return w1, b1, w2, b2, w3, b3


def encoder_reference(x, w1, b1, w2, b2, w3, b3):
    h = jax.nn.relu(x @ w1 + b1)
    h = jax.nn.relu(h @ w2 + b2)
    return h @ w3 + b3


if __name__ == "__main__":
    input_dim = 32
    code_dim = 16

    key = jax.random.PRNGKey(0)
    kx, kx2, kp = jax.random.split(key, 3)
    params = make_encoder_params(kp, input_dim, code_dim)

    # case 1: small batch (tile clamps to 8, grid = 1)
    x = jax.random.normal(kx, (8, input_dim), jnp.float32)
    out = jax.block_until_ready(encoder_forward(x, *params))
    ref = encoder_reference(x, *params)
    assert out.shape == (8, code_dim), out.shape
    # bf16 matmul operands with f32 accumulation -> ~1e-2 level error vs f32 ref
    assert jnp.allclose(out, ref, atol=5e-2, rtol=5e-2), "mismatch vs reference (case 1)"

    # case 2: batch not divisible by the tile (exercises the padding path, grid > 1)
    x2 = jax.random.normal(kx2, (130, input_dim), jnp.float32)
    out2 = jax.block_until_ready(encoder_forward(x2, *params, block_b=64))
    ref2 = encoder_reference(x2, *params)
    assert out2.shape == (130, code_dim), out2.shape
    assert jnp.allclose(out2, ref2, atol=5e-2, rtol=5e-2), "mismatch vs reference (case 2)"

    print("KERNEL_OK")
</pallas_src>

<mosaic_0001>
module attributes {stable_mosaic.version = 11 : i64} {
  func.func @_encoder_kernel(%arg0: i32, %arg1: memref<8x32xbf16, #tpu.memory_space<vmem>>, %arg2: memref<32x512xbf16, #tpu.memory_space<vmem>>, %arg3: memref<1x512xf32, #tpu.memory_space<vmem>>, %arg4: memref<512x256xbf16, #tpu.memory_space<vmem>>, %arg5: memref<1x256xf32, #tpu.memory_space<vmem>>, %arg6: memref<256x128xbf16, #tpu.memory_space<vmem>>, %arg7: memref<1x128xf32, #tpu.memory_space<vmem>>, %arg8: memref<8x128xf32, #tpu.memory_space<vmem>>) attributes {dimension_semantics = [#tpu.dimension_semantics<parallel>], iteration_bounds = array<i64: 1>, scalar_prefetch = 0 : i64, scratch_operands = 0 : i64, tpu.core_type = #tpu.core_type<tc>, window_params = [{transform_indices = @transform_0, window_bounds = array<i64: 8, 32>}, {pipeline_mode = #tpu.pipeline_mode<synchronous>, transform_indices = @transform_1, window_bounds = array<i64: 32, 512>}, {pipeline_mode = #tpu.pipeline_mode<synchronous>, transform_indices = @transform_2, window_bounds = array<i64: 1, 512>}, {pipeline_mode = #tpu.pipeline_mode<synchronous>, transform_indices = @transform_3, window_bounds = array<i64: 512, 256>}, {pipeline_mode = #tpu.pipeline_mode<synchronous>, transform_indices = @transform_4, window_bounds = array<i64: 1, 256>}, {pipeline_mode = #tpu.pipeline_mode<synchronous>, transform_indices = @transform_5, window_bounds = array<i64: 256, 128>}, {pipeline_mode = #tpu.pipeline_mode<synchronous>, transform_indices = @transform_6, window_bounds = array<i64: 1, 128>}, {transform_indices = @transform_7, window_bounds = array<i64: 8, 128>}]} {
    %c0 = arith.constant 0 : index
    %c0_0 = arith.constant 0 : index
    %0 = vector.load %arg1[%c0, %c0_0] : memref<8x32xbf16, #tpu.memory_space<vmem>>, vector<8x32xbf16>
    %c0_1 = arith.constant 0 : index
    %c0_2 = arith.constant 0 : index
    %1 = vector.load %arg2[%c0_1, %c0_2] : memref<32x512xbf16, #tpu.memory_space<vmem>>, vector<32x512xbf16>
    %cst = arith.constant dense<0.000000e+00> : vector<8x512xf32>
    %2 = tpu.matmul %0, %1, %cst {dimension_numbers = #tpu.dot_dimension_numbers<[1], [0], [0], [1], [0, 0, 1, 1], [], []>} : vector<8x32xbf16>, vector<32x512xbf16>, vector<8x512xf32> -> vector<8x512xf32>
    %c0_3 = arith.constant 0 : index
    %c0_4 = arith.constant 0 : index
    %3 = vector.load %arg3[%c0_3, %c0_4] : memref<1x512xf32, #tpu.memory_space<vmem>>, vector<1x512xf32>
    %4 = vector.broadcast %3 : vector<1x512xf32> to vector<8x512xf32>
    %5 = arith.addf %2, %4 : vector<8x512xf32>
    %cst_5 = arith.constant 0.000000e+00 : f32
    %6 = vector.broadcast %cst_5 : f32 to vector<8x512xf32>
    %7 = arith.maximumf %5, %6 : vector<8x512xf32>
    %8 = arith.truncf %7 : vector<8x512xf32> to vector<8x512xbf16>
    %c0_6 = arith.constant 0 : index
    %c0_7 = arith.constant 0 : index
    %9 = vector.load %arg4[%c0_6, %c0_7] : memref<512x256xbf16, #tpu.memory_space<vmem>>, vector<512x256xbf16>
    %cst_8 = arith.constant dense<0.000000e+00> : vector<8x256xf32>
    %10 = tpu.matmul %8, %9, %cst_8 {dimension_numbers = #tpu.dot_dimension_numbers<[1], [0], [0], [1], [0, 0, 1, 1], [], []>} : vector<8x512xbf16>, vector<512x256xbf16>, vector<8x256xf32> -> vector<8x256xf32>
    %c0_9 = arith.constant 0 : index
    %c0_10 = arith.constant 0 : index
    %11 = vector.load %arg5[%c0_9, %c0_10] : memref<1x256xf32, #tpu.memory_space<vmem>>, vector<1x256xf32>
    %12 = vector.broadcast %11 : vector<1x256xf32> to vector<8x256xf32>
    %13 = arith.addf %10, %12 : vector<8x256xf32>
    %cst_11 = arith.constant 0.000000e+00 : f32
    %14 = vector.broadcast %cst_11 : f32 to vector<8x256xf32>
    %15 = arith.maximumf %13, %14 : vector<8x256xf32>
    %16 = arith.truncf %15 : vector<8x256xf32> to vector<8x256xbf16>
    %c0_12 = arith.constant 0 : index
    %c0_13 = arith.constant 0 : index
    %17 = vector.load %arg6[%c0_12, %c0_13] : memref<256x128xbf16, #tpu.memory_space<vmem>>, vector<256x128xbf16>
    %cst_14 = arith.constant dense<0.000000e+00> : vector<8x128xf32>
    %18 = tpu.matmul %16, %17, %cst_14 {dimension_numbers = #tpu.dot_dimension_numbers<[1], [0], [0], [1], [0, 0, 1, 1], [], []>} : vector<8x256xbf16>, vector<256x128xbf16>, vector<8x128xf32> -> vector<8x128xf32>
    %c0_15 = arith.constant 0 : index
    %c0_16 = arith.constant 0 : index
    %19 = vector.load %arg7[%c0_15, %c0_16] : memref<1x128xf32, #tpu.memory_space<vmem>>, vector<1x128xf32>
    %20 = vector.broadcast %19 : vector<1x128xf32> to vector<8x128xf32>
    %21 = arith.addf %18, %20 : vector<8x128xf32>
    %c0_17 = arith.constant 0 : index
    %c0_18 = arith.constant 0 : index
    %22 = vector.load %arg8[%c0_17, %c0_18] : memref<8x128xf32, #tpu.memory_space<vmem>>, vector<8x128xf32>
    tpu.vector_store %arg8[%c0_17, %c0_18], %21 {strides = array<i32>} : memref<8x128xf32, #tpu.memory_space<vmem>>, vector<8x128xf32>,
    return
  }
  func.func @transform_0(%arg0: i32) -> (i32, i32) {
    %c0_i32 = arith.constant 0 : i32
    %c0_i32_0 = arith.constant 0 : i32
    return %arg0, %c0_i32 : i32, i32
  }
  func.func @transform_1(%arg0: i32) -> (i32, i32) {
    %c0_i32 = arith.constant 0 : i32
    %c0_i32_0 = arith.constant 0 : i32
    %c0_i32_1 = arith.constant 0 : i32
    return %c0_i32, %c0_i32_0 : i32, i32
  }
  func.func @transform_2(%arg0: i32) -> (i32, i32) {
    %c0_i32 = arith.constant 0 : i32
    %c0_i32_0 = arith.constant 0 : i32
    %c0_i32_1 = arith.constant 0 : i32
    return %c0_i32, %c0_i32_0 : i32, i32
  }
  func.func @transform_3(%arg0: i32) -> (i32, i32) {
    %c0_i32 = arith.constant 0 : i32
    %c0_i32_0 = arith.constant 0 : i32
    %c0_i32_1 = arith.constant 0 : i32
    return %c0_i32, %c0_i32_0 : i32, i32
  }
  func.func @transform_4(%arg0: i32) -> (i32, i32) {
    %c0_i32 = arith.constant 0 : i32
    %c0_i32_0 = arith.constant 0 : i32
    %c0_i32_1 = arith.constant 0 : i32
    return %c0_i32, %c0_i32_0 : i32, i32
  }
  func.func @transform_5(%arg0: i32) -> (i32, i32) {
    %c0_i32 = arith.constant 0 : i32
    %c0_i32_0 = arith.constant 0 : i32
    %c0_i32_1 = arith.constant 0 : i32
    return %c0_i32, %c0_i32_0 : i32, i32
  }
  func.func @transform_6(%arg0: i32) -> (i32, i32) {
    %c0_i32 = arith.constant 0 : i32
    %c0_i32_0 = arith.constant 0 : i32
    %c0_i32_1 = arith.constant 0 : i32
    return %c0_i32, %c0_i32_0 : i32, i32
  }
  func.func @transform_7(%arg0: i32) -> (i32, i32) {
    %c0_i32 = arith.constant 0 : i32
    %c0_i32_0 = arith.constant 0 : i32
    return %arg0, %c0_i32 : i32, i32
  }
}

</mosaic_0001>

<bundles_post_ra>
// kernel: encoder_forward.1
= control target key start
LH: loop header
LB: loop body
LE: loop exit
PB: predicated region body
PF: predicated region fallthrough
CT: control target
= control target key end

     0   :  { %vm87_vm0 = vcmask 261120   ;;  %s1842_s0 = inlined_call_operand.vmem [shape: bf16[8,32], index: 0, kind: input, shape index: {}]   ;;  %s1843_s1 = inlined_call_operand.vmem [shape: bf16[32,512], index: 1, kind: input, shape index: {}]   ;;  %s1844_s2 = inlined_call_operand.vmem [shape: f32[1,512], index: 2, kind: input, shape index: {}]   ;;  %s1845_s3 = inlined_call_operand.vmem [shape: bf16[512,256], index: 3, kind: input, shape index: {}]   ;;  %s1846_s4 = inlined_call_operand.vmem [shape: f32[1,256], index: 4, kind: input, shape index: {}]   ;;  %s1847_s5 = inlined_call_operand.vmem [shape: bf16[256,128], index: 5, kind: input, shape index: {}]   ;;  %s1848_s6 = inlined_call_operand.vmem [shape: f32[1,128], index: 6, kind: input, shape index: {}]   ;;  %s1849_s7 = inlined_call_operand.hbm [shape: f32[8,128], index: 7, kind: output, shape index: {}]  }
   0x1   :  { %v842_v0 = vld [vmem:[%s1843_s1 + $0x20] sm:$0xf]  ;;  %v1186_v1 = vld [vmem:[%s1843_s1 + $0x2c] sm:$0xf0]  ;;  %v1184_v2 = vld [vmem:[%s1843_s1 + $0x24] sm:$0xf] }
   0x2   :  { %v843_v3 = vor.u32 %v1186_v1, %v842_v0  ;;  %v844_v4 = vld [vmem:[%s1843_s1 + $0x30] sm:$0xf0]  ;;  %v826_v5 = vld [vmem:[%s1843_s1] sm:$0xf]  ;;  %v1182_v6 = vld [vmem:[%s1843_s1 + $0xc] sm:$0xf0] }
   0x3   :  { %v847_v7 = vor.u32 %v1184_v2, %v844_v4  ;;  %v1180_v8 = vld [vmem:[%s1843_s1 + $0x4] sm:$0xf]  ;;  %v828_v9 = vld [vmem:[%s1843_s1 + $0x10] sm:$0xf0]  ;;  %v827_v10 = vor.u32 %v1182_v6, %v826_v5  ;;  %v850_v11 = vld [vmem:[%s1843_s1 + $0x28] sm:$0xf] }
   0x4   :  { %97 = vmatpush.bf16.msra.mxu2 %v843_v3  ;;  %v1187_v12 = vld [vmem:[%s1843_s1 + $0x34] sm:$0xf0]  ;;  %v831_v13 = vor.u32 %v1180_v8, %v828_v9  ;;  %v1185_v15 = vld [vmem:[%s1843_s1 + $0x2c] sm:$0xf]  ;;  %v852_v16 = vld [vmem:[%s1843_s1 + $0x38] sm:$0xf0] }
   0x5   :  { %110 = vmatpush.bf16.msra.mxu3 %v847_v7  ;;  %v851_v14 = vor.u32 %v1187_v12, %v850_v11  ;;  %v834_v17 = vld [vmem:[%s1843_s1 + $0x8] sm:$0xf]  ;;  %v1379_v18 = vld [vmem:[%s1842_s0] sm:$0xf]  ;;  %v855_v19 = vor.u32 %v1185_v15, %v852_v16  ;;  %v1183_v20 = vld [vmem:[%s1843_s1 + $0x14] sm:$0xf0] }
   0x6   :  { %v1181_v21 = vld [vmem:[%s1843_s1 + $0xc] sm:$0xf]  ;;  %v836_v22 = vld [vmem:[%s1843_s1 + $0x18] sm:$0xf0]  ;;  %v918_v23 = vld [vmem:[%s1845_s3 + $0x70] sm:$0xf]  ;;  %v835_v30 = vor.u32 %v1183_v20, %v834_v17 }
   0x7   :  { %v1203_v24 = vld [vmem:[%s1845_s3 + $0x74] sm:$0xf0]  ;;  %v982_v25 = vld [vmem:[%s1845_s3 + $0xf0] sm:$0xf]  ;;  %v910_v28 = vld [vmem:[%s1845_s3 + $0x60] sm:$0xf]  ;;  %v839_v34 = vor.u32 %v1181_v21, %v836_v22 }
   0x8   :  { %98 = vmatpush.bf16.msra.mxu2 %v827_v10  ;;  %v919_v26 = vor.u32 %v1203_v24, %v918_v23  ;;  %v1219_v27 = vld [vmem:[%s1845_s3 + $0xf4] sm:$0xf0]  ;;  %v1201_v29 = vld [vmem:[%s1845_s3 + $0x64] sm:$0xf0]  ;;  %v974_v32 = vld [vmem:[%s1845_s3 + $0xe0] sm:$0xf] }
   0x9   :  { %111 = vmatpush.bf16.msra.mxu3 %v831_v13  ;;  %v983_v31 = vor.u32 %v1219_v27, %v982_v25  ;;  %v1217_v33 = vld [vmem:[%s1845_s3 + $0xe4] sm:$0xf0]  ;;  %v911_v35 = vor.u32 %v1201_v29, %v910_v28  ;;  %v902_v37 = vld [vmem:[%s1845_s3 + $0x50] sm:$0xf]  ;;  %v1199_v38 = vld [vmem:[%s1845_s3 + $0x54] sm:$0xf0] }
   0xa   :  { %541 = vmatpush.bf16.msra.mxu0 %v919_v26  ;;  %v975_v36 = vor.u32 %v1217_v33, %v974_v32  ;;  %v966_v39 = vld [vmem:[%s1845_s3 + $0xd0] sm:$0xf]  ;;  %v1215_v40 = vld [vmem:[%s1845_s3 + $0xd4] sm:$0xf0]  ;;  %v903_v42 = vor.u32 %v1199_v38, %v902_v37  ;;  %v894_v47 = vld [vmem:[%s1845_s3 + $0x40] sm:$0xf] }
   0xb   :  { %856 = vmatmul.msk.bf16.vlgmr.msra.gmra.mxu2 %vm87_vm0, %v1379_v18  ;;  %554 = vmatpush.bf16.msra.mxu1 %v983_v31  ;;  %v1046_v41 = vld [vmem:[%s1845_s3 + $0x170] sm:$0xf]  ;;  %v1235_v43 = vld [vmem:[%s1845_s3 + $0x174] sm:$0xf0]  ;;  %v967_v46 = vor.u32 %v1215_v40, %v966_v39  ;;  %v1197_v48 = vld [vmem:[%s1845_s3 + $0x44] sm:$0xf0] }
   0xc   :  { %123 = vmatpush.bf16.msrb.mxu2 %v851_v14  ;;  %857 = vmatmul.msk.bf16.vlgmr.msra.gmra.mxu3 %vm87_vm0, %v1379_v18  ;;  %v1110_v44 = vld [vmem:[%s1845_s3 + $0x1f0] sm:$0xf]  ;;  %v1251_v45 = vld [vmem:[%s1845_s3 + $0x1f4] sm:$0xf0]  ;;  %v958_v49 = vld [vmem:[%s1845_s3 + $0xc0] sm:$0xf]  ;;  %v1047_v50 = vor.u32 %v1235_v43, %v1046_v41  ;;  %v895_v58 = vor.u32 %v1197_v48, %v894_v47 }
   0xd   :  { %136 = vmatpush.bf16.msrb.mxu3 %v855_v19  ;;  %v1111_v51 = vor.u32 %v1251_v45, %v1110_v44  ;;  %v1213_v52 = vld [vmem:[%s1845_s3 + $0xc4] sm:$0xf0]  ;;  %v1038_v53 = vld [vmem:[%s1845_s3 + $0x160] sm:$0xf]  ;;  %v886_v59 = vld [vmem:[%s1845_s3 + $0x30] sm:$0xf] }
   0xe   :  { %542 = vmatpush.bf16.msra.mxu0 %v911_v35  ;;  %v1233_v54 = vld [vmem:[%s1845_s3 + $0x164] sm:$0xf0]  ;;  %v1102_v56 = vld [vmem:[%s1845_s3 + $0x1e0] sm:$0xf]  ;;  %v1195_v60 = vld [vmem:[%s1845_s3 + $0x34] sm:$0xf0]  ;;  %v959_v62 = vor.u32 %v1213_v52, %v958_v49 }
   0xf   :  { %555 = vmatpush.bf16.msra.mxu1 %v975_v36  ;;  %v1039_v55 = vor.u32 %v1233_v54, %v1038_v53  ;;  %v1249_v57 = vld [vmem:[%s1845_s3 + $0x1e4] sm:$0xf0]  ;;  %v1030_v63 = vld [vmem:[%s1845_s3 + $0x150] sm:$0xf]  ;;  %v1231_v0 = vld [vmem:[%s1845_s3 + $0x154] sm:$0xf0]  ;;  %v887_v8 = vor.u32 %v1195_v60, %v886_v59 }
  0x10   :  { %124 = vmatpush.bf16.msrb.mxu2 %v835_v30  ;;  %v1103_v61 = vor.u32 %v1249_v57, %v1102_v56  ;;  %v1094_v1 = vld [vmem:[%s1845_s3 + $0x1d0] sm:$0xf]  ;;  %v1211_v3 = vld [vmem:[%s1845_s3 + $0xb4] sm:$0xf0]  ;;  %v1031_v5 = vor.u32 %v1231_v0, %v1030_v63  ;;  %v1022_v7 = vld [vmem:[%s1845_s3 + $0x140] sm:$0xf] }
  0x11   :  { %137 = vmatpush.bf16.msrb.mxu3 %v839_v34  ;;  %v950_v2 = vld [vmem:[%s1845_s3 + $0xb0] sm:$0xf]  ;;  %v1247_v4 = vld [vmem:[%s1845_s3 + $0x1d4] sm:$0xf0]  ;;  %v1229_v9 = vld [vmem:[%s1845_s3 + $0x144] sm:$0xf0] }
  0x12   :  { %543 = vmatpush.bf16.msra.mxu0 %v903_v42  ;;  %v1095_v6 = vor.u32 %v1247_v4, %v1094_v1  ;;  %v1086_v10 = vld [vmem:[%s1845_s3 + $0x1c0] sm:$0xf]  ;;  %v1245_v11 = vld [vmem:[%s1845_s3 + $0x1c4] sm:$0xf0]  ;;  %v951_v12 = vor.u32 %v1211_v3, %v950_v2  ;;  %v1023_v17 = vor.u32 %v1229_v9, %v1022_v7  ;;  %v1014_v20 = vld [vmem:[%s1845_s3 + $0x130] sm:$0xf] }
  0x13   :  { %556 = vmatpush.bf16.msra.mxu1 %v967_v46  ;;  %v878_v13 = vld [vmem:[%s1845_s3 + $0x20] sm:$0xf]  ;;  %v1193_v14 = vld [vmem:[%s1845_s3 + $0x24] sm:$0xf0]  ;;  %v1087_v19 = vor.u32 %v1245_v11, %v1086_v10  ;;  %v1227_v22 = vld [vmem:[%s1845_s3 + $0x134] sm:$0xf0] }
  0x14   :  { %567 = vmatpush.bf16.msra.mxu2 %v1047_v50  ;;  %v942_v15 = vld [vmem:[%s1845_s3 + $0xa0] sm:$0xf]  ;;  %v1209_v16 = vld [vmem:[%s1845_s3 + $0xa4] sm:$0xf0]  ;;  %v879_v21 = vor.u32 %v1193_v14, %v878_v13  ;;  %v1078_v23 = vld [vmem:[%s1845_s3 + $0x1b0] sm:$0xf]  ;;  %v1015_v30 = vor.u32 %v1227_v22, %v1014_v20 }
  0x15   :  { %580 = vmatpush.bf16.msra.mxu3 %v1111_v51  ;;  %v1243_v24 = vld [vmem:[%s1845_s3 + $0x1b4] sm:$0xf0]  ;;  %v943_v25 = vor.u32 %v1209_v16, %v942_v15  ;;  %v870_v26 = vld [vmem:[%s1845_s3 + $0x10] sm:$0xf]  ;;  %v1006_v32 = vld [vmem:[%s1845_s3 + $0x120] sm:$0xf] }
  0x16   :  { %544 = vmatpush.bf16.msra.mxu0 %v895_v58  ;;  %v1191_v27 = vld [vmem:[%s1845_s3 + $0x14] sm:$0xf0]  ;;  %v934_v28 = vld [vmem:[%s1845_s3 + $0x90] sm:$0xf]  ;;  %v1079_v31 = vor.u32 %v1243_v24, %v1078_v23 }
  0x17   :  { %557 = vmatpush.bf16.msra.mxu1 %v959_v62  ;;  %v1207_v29 = vld [vmem:[%s1845_s3 + $0x94] sm:$0xf0] }
  0x18   :  { %568 = vmatpush.bf16.msra.mxu2 %v1039_v55 }
  0x19   :  { %581 = vmatpush.bf16.msra.mxu3 %v1103_v61 }
  0x1a   :  { %545 = vmatpush.bf16.msra.mxu0 %v887_v8 }
  0x1b   :  { %858 = vmatmul.msk.bf16.vlgmr.msrb.gmra.mxu2 %vm87_vm0, %v1379_v18  ;;  %558 = vmatpush.bf16.msra.mxu1 %v951_v12 }
  0x1c   :  { %569 = vmatpush.bf16.msra.mxu2 %v1031_v5  ;;  %859 = vmatmul.msk.bf16.vlgmr.msrb.gmra.mxu3 %vm87_vm0, %v1379_v18 }
  0x1d   :  { %582 = vmatpush.bf16.msra.mxu3 %v1095_v6 }
  0x20   :  { %570 = vmatpush.bf16.msra.mxu2 %v1023_v17 }
  0x21   :  { %583 = vmatpush.bf16.msra.mxu3 %v1087_v19 }
  0x22   :  { %12 = vsyncpa [#allocation3], 0  ;;  %546 = vmatpush.bf16.msra.mxu0 %v879_v21  ;;  %v871_v33 = vor.u32 %v1191_v27, %v870_v26  ;;  %v1225_v18 = vld [vmem:[%s1845_s3 + $0x124] sm:$0xf0]  ;;  %v1070_v34 = vld [vmem:[%s1845_s3 + $0x1a0] sm:$0xf]  ;;  %559 = vmatpush.bf16.msra.mxu1 %v943_v25  ;;  %v935_v36 = vor.u32 %v1207_v29, %v934_v28 }
  0x23   :  { %v1241_v35 = vld [vmem:[%s1845_s3 + $0x1a4] sm:$0xf0]  ;;  %v862_v37 = vld [vmem:[%s1845_s3] sm:$0xf]  ;;  %v1202_v41 = vld [vmem:[%s1845_s3 + $0x74] sm:$0xf]  ;;  %v1007_v45 = vor.u32 %v1225_v18, %v1006_v32 }
  0x24   :  { %v1189_v38 = vld [vmem:[%s1845_s3 + $0x4] sm:$0xf0]  ;;  %v926_v39 = vld [vmem:[%s1845_s3 + $0x80] sm:$0xf]  ;;  %v920_v42 = vld [vmem:[%s1845_s3 + $0x78] sm:$0xf0]  ;;  %571 = vmatpush.bf16.msra.mxu2 %v1015_v30  ;;  %v1071_v46 = vor.u32 %v1241_v35, %v1070_v34 }
  0x25   :  { %v1205_v40 = vld [vmem:[%s1845_s3 + $0x84] sm:$0xf0]  ;;  %v1218_v43 = vld [vmem:[%s1845_s3 + $0xf4] sm:$0xf]  ;;  %v984_v44 = vld [vmem:[%s1845_s3 + $0xf8] sm:$0xf0]  ;;  %584 = vmatpush.bf16.msra.mxu3 %v1079_v31  ;;  %v863_v47 = vor.u32 %v1189_v38, %v862_v37  ;;  %v923_v49 = vor.u32 %v1202_v41, %v920_v42 }
  0x26   :  { %547 = vmatpush.bf16.msra.mxu0 %v871_v33  ;;  %560 = vmatpush.bf16.msra.mxu1 %v935_v36  ;;  %v927_v48 = vor.u32 %v1205_v40, %v926_v39  ;;  %v987_v50 = vor.u32 %v1218_v43, %v984_v44  ;;  %v1200_v51 = vld [vmem:[%s1845_s3 + $0x64] sm:$0xf]  ;;  %v912_v52 = vld [vmem:[%s1845_s3 + $0x68] sm:$0xf0]  ;;  %v1198_v57 = vld [vmem:[%s1845_s3 + $0x54] sm:$0xf] }
  0x27   :  { %v1216_v53 = vld [vmem:[%s1845_s3 + $0xe4] sm:$0xf]  ;;  %v976_v54 = vld [vmem:[%s1845_s3 + $0xe8] sm:$0xf0]  ;;  %v915_v55 = vor.u32 %v1200_v51, %v912_v52  ;;  %v904_v58 = vld [vmem:[%s1845_s3 + $0x58] sm:$0xf0] }
  0x28   :  { %572 = vmatpush.bf16.msra.mxu2 %v1007_v45  ;;  %v979_v56 = vor.u32 %v1216_v53, %v976_v54  ;;  %v1214_v59 = vld [vmem:[%s1845_s3 + $0xd4] sm:$0xf]  ;;  %v907_v60 = vor.u32 %v1198_v57, %v904_v58  ;;  %v968_v61 = vld [vmem:[%s1845_s3 + $0xd8] sm:$0xf0]  ;;  %v998_v63 = vld [vmem:[%s1845_s3 + $0x110] sm:$0xf] }
  0x29   :  { %585 = vmatpush.bf16.msra.mxu3 %v1071_v46  ;;  %v971_v62 = vor.u32 %v1214_v59, %v968_v61  ;;  %v1223_v0 = vld [vmem:[%s1845_s3 + $0x114] sm:$0xf0]  ;;  %v1062_v1 = vld [vmem:[%s1845_s3 + $0x190] sm:$0xf]  ;;  %v1196_v4 = vld [vmem:[%s1845_s3 + $0x44] sm:$0xf] }
  0x2a   :  { %548 = vmatpush.bf16.msra.mxu0 %v863_v47  ;;  %561 = vmatpush.bf16.msra.mxu1 %v927_v48  ;;  %v999_v2 = vor.u32 %v1223_v0, %v998_v63  ;;  %v1239_v3 = vld [vmem:[%s1845_s3 + $0x194] sm:$0xf0]  ;;  %v896_v5 = vld [vmem:[%s1845_s3 + $0x48] sm:$0xf0]  ;;  %v1212_v8 = vld [vmem:[%s1845_s3 + $0xc4] sm:$0xf] }
  0x2b   :  { %v1063_v6 = vor.u32 %v1239_v3, %v1062_v1  ;;  %v899_v7 = vor.u32 %v1196_v4, %v896_v5  ;;  %v960_v9 = vld [vmem:[%s1845_s3 + $0xc8] sm:$0xf0]  ;;  %v990_v11 = vld [vmem:[%s1845_s3 + $0x100] sm:$0xf]  ;;  %v1221_v12 = vld [vmem:[%s1845_s3 + $0x104] sm:$0xf0] }
  0x2c   :  { %573 = vmatpush.bf16.msra.mxu2 %v999_v2  ;;  %v963_v10 = vor.u32 %v1212_v8, %v960_v9  ;;  %v1054_v13 = vld [vmem:[%s1845_s3 + $0x180] sm:$0xf]  ;;  %v991_v14 = vor.u32 %v1221_v12, %v990_v11  ;;  %v1237_v15 = vld [vmem:[%s1845_s3 + $0x184] sm:$0xf0]  ;;  %v1194_v16 = vld [vmem:[%s1845_s3 + $0x34] sm:$0xf] }
  0x2d   :  { %586 = vmatpush.bf16.msra.mxu3 %v1063_v6  ;;  %v888_v17 = vld [vmem:[%s1845_s3 + $0x38] sm:$0xf0]  ;;  %v1055_v19 = vor.u32 %v1237_v15, %v1054_v13  ;;  %v1210_v21 = vld [vmem:[%s1845_s3 + $0xb4] sm:$0xf]  ;;  %v1192_v30 = vld [vmem:[%s1845_s3 + $0x24] sm:$0xf] }
  0x2e   :  { %593 = vmatpush.bf16.msrb.mxu0 %v923_v49  ;;  %606 = vmatpush.bf16.msrb.mxu1 %v987_v50  ;;  %v891_v20 = vor.u32 %v1194_v16, %v888_v17  ;;  %v952_v22 = vld [vmem:[%s1845_s3 + $0xb8] sm:$0xf0]  ;;  %v1234_v23 = vld [vmem:[%s1845_s3 + $0x174] sm:$0xf]  ;;  %v880_v31 = vld [vmem:[%s1845_s3 + $0x28] sm:$0xf0] }
  0x2f   :  { %v955_v24 = vor.u32 %v1210_v21, %v952_v22  ;;  %v1048_v25 = vld [vmem:[%s1845_s3 + $0x178] sm:$0xf0]  ;;  %v1250_v26 = vld [vmem:[%s1845_s3 + $0x1f4] sm:$0xf]  ;;  %v1208_v32 = vld [vmem:[%s1845_s3 + $0xa4] sm:$0xf]  ;;  %v883_v33 = vor.u32 %v1192_v30, %v880_v31 }
  0x30   :  { %574 = vmatpush.bf16.msra.mxu2 %v991_v14  ;;  %v1112_v27 = vld [vmem:[%s1845_s3 + $0x1f8] sm:$0xf0]  ;;  %v1051_v28 = vor.u32 %v1234_v23, %v1048_v25  ;;  %v944_v18 = vld [vmem:[%s1845_s3 + $0xa8] sm:$0xf0]  ;;  %v1232_v34 = vld [vmem:[%s1845_s3 + $0x164] sm:$0xf] }
  0x31   :  { %587 = vmatpush.bf16.msra.mxu3 %v1055_v19  ;;  %v1115_v29 = vor.u32 %v1250_v26, %v1112_v27  ;;  %v1040_v35 = vld [vmem:[%s1845_s3 + $0x168] sm:$0xf0]  ;;  %v947_v36 = vor.u32 %v1208_v32, %v944_v18  ;;  %v1248_v38 = vld [vmem:[%s1845_s3 + $0x1e4] sm:$0xf]  ;;  %v1190_v41 = vld [vmem:[%s1845_s3 + $0x14] sm:$0xf] }
  0x32   :  { %594 = vmatpush.bf16.msrb.mxu0 %v915_v55  ;;  %607 = vmatpush.bf16.msrb.mxu1 %v979_v56  ;;  %v1043_v37 = vor.u32 %v1232_v34, %v1040_v35  ;;  %v1104_v39 = vld [vmem:[%s1845_s3 + $0x1e8] sm:$0xf0]  ;;  %v872_v42 = vld [vmem:[%s1845_s3 + $0x18] sm:$0xf0]  ;;  %v1206_v43 = vld [vmem:[%s1845_s3 + $0x94] sm:$0xf] }
  0x33   :  { %v1107_v40 = vor.u32 %v1248_v38, %v1104_v39  ;;  %v875_v44 = vor.u32 %v1190_v41, %v872_v42  ;;  %v936_v45 = vld [vmem:[%s1845_s3 + $0x98] sm:$0xf0]  ;;  %v1230_v46 = vld [vmem:[%s1845_s3 + $0x154] sm:$0xf]  ;;  %v1188_v53 = vld [vmem:[%s1845_s3 + $0x4] sm:$0xf] }
  0x34   :  { %619 = vmatpush.bf16.msrb.mxu2 %v1051_v28  ;;  %v1032_v47 = vld [vmem:[%s1845_s3 + $0x158] sm:$0xf0]  ;;  %v939_v48 = vor.u32 %v1206_v43, %v936_v45  ;;  %v1246_v50 = vld [vmem:[%s1845_s3 + $0x1d4] sm:$0xf]  ;;  %v864_v54 = vld [vmem:[%s1845_s3 + $0x8] sm:$0xf0] }
  0x35   :  { %632 = vmatpush.bf16.msrb.mxu3 %v1115_v29  ;;  %v1035_v49 = vor.u32 %v1230_v46, %v1032_v47  ;;  %v1096_v51 = vld [vmem:[%s1845_s3 + $0x1d8] sm:$0xf0]  ;;  %v1204_v55 = vld [vmem:[%s1845_s3 + $0x84] sm:$0xf]  ;;  %v867_v56 = vor.u32 %v1188_v53, %v864_v54  ;;  %v928_v57 = vld [vmem:[%s1845_s3 + $0x88] sm:$0xf0] }
  0x36   :  { %595 = vmatpush.bf16.msrb.mxu0 %v907_v60  ;;  %608 = vmatpush.bf16.msrb.mxu1 %v971_v62  ;;  %v1099_v52 = vor.u32 %v1246_v50, %v1096_v51  ;;  %v1228_v58 = vld [vmem:[%s1845_s3 + $0x144] sm:$0xf]  ;;  %v1024_v59 = vld [vmem:[%s1845_s3 + $0x148] sm:$0xf0]  ;;  %v931_v60 = vor.u32 %v1204_v55, %v928_v57  ;;  %v1226_v1 = vld [vmem:[%s1845_s3 + $0x134] sm:$0xf] }
  0x37   :  { %v1027_v61 = vor.u32 %v1228_v58, %v1024_v59  ;;  %v1244_v62 = vld [vmem:[%s1845_s3 + $0x1c4] sm:$0xf]  ;;  %v1088_v63 = vld [vmem:[%s1845_s3 + $0x1c8] sm:$0xf0]  ;;  %v1016_v2 = vld [vmem:[%s1845_s3 + $0x138] sm:$0xf0] }
  0x38   :  { %620 = vmatpush.bf16.msrb.mxu2 %v1043_v37  ;;  %v1091_v0 = vor.u32 %v1244_v62, %v1088_v63  ;;  %v1242_v3 = vld [vmem:[%s1845_s3 + $0x1b4] sm:$0xf]  ;;  %v1019_v4 = vor.u32 %v1226_v1, %v1016_v2  ;;  %v1080_v5 = vld [vmem:[%s1845_s3 + $0x1b8] sm:$0xf0]  ;;  %v1008_v8 = vld [vmem:[%s1845_s3 + $0x128] sm:$0xf0] }
  0x39   :  { %633 = vmatpush.bf16.msrb.mxu3 %v1107_v40  ;;  %v1083_v6 = vor.u32 %v1242_v3, %v1080_v5  ;;  %v1240_v9 = vld [vmem:[%s1845_s3 + $0x1a4] sm:$0xf]  ;;  %v1072_v11 = vld [vmem:[%s1845_s3 + $0x1a8] sm:$0xf0]  ;;  %v1222_v14 = vld [vmem:[%s1845_s3 + $0x114] sm:$0xf] }
  0x3a   :  { %596 = vmatpush.bf16.msrb.mxu0 %v899_v7  ;;  %609 = vmatpush.bf16.msrb.mxu1 %v963_v10  ;;  %v1224_v7 = vld [vmem:[%s1845_s3 + $0x124] sm:$0xf]  ;;  %v37_v10 = vld [vmem:[%s1844_s2] sm:$0xf]  ;;  %v1075_v13 = vor.u32 %v1240_v9, %v1072_v11  ;;  %v1000_v15 = vld [vmem:[%s1845_s3 + $0x118] sm:$0xf0] }
  0x3b   :  { %v1011_v12 = vor.u32 %v1224_v7, %v1008_v8  ;;  %v1238_v16 = vld [vmem:[%s1845_s3 + $0x194] sm:$0xf]  ;;  %v1064_v17 = vld [vmem:[%s1845_s3 + $0x198] sm:$0xf0]  ;;  %v39_v19 = vperm.slane %v37_v10, 0  ;;  %v1003_v21 = vor.u32 %v1222_v14, %v1000_v15  ;;  %v41_v38 = vperm.slane %v37_v10, 2 }
  0x3c   :  { %621 = vmatpush.bf16.msrb.mxu2 %v1035_v49  ;;  %v1067_v22 = vor.u32 %v1238_v16, %v1064_v17  ;;  %v992_v25 = vld [vmem:[%s1845_s3 + $0x108] sm:$0xf0]  ;;  %v1236_v28 = vld [vmem:[%s1845_s3 + $0x184] sm:$0xf]  ;;  %v42_v39 = vperm.slane %v37_v10, 3  ;;  %v1259_v50 = vld [vmem:[%s1847_s5 + $0x38] sm:$0xff] }
  0x3d   :  { %634 = vmatpush.bf16.msrb.mxu3 %v1099_v52  ;;  %v1056_v29 = vld [vmem:[%s1845_s3 + $0x188] sm:$0xf0]  ;;  %v1258_v51 = vld [vmem:[%s1847_s5 + $0x30] sm:$0xff]  ;;  %v1256_v53 = vld [vmem:[%s1847_s5 + $0x20] sm:$0xff]  ;;  %s1296_s23 = smov [#allocation2]   ;;  %s815_s27 = sshll.u32 %s1849_s7, 4  ;;  %s816_s27 = int_to_ptr.hbm [resolvable:$true] %s815_s27 }
  0x3e   :  { %597 = vmatpush.bf16.msrb.mxu0 %v891_v20  ;;  %610 = vmatpush.bf16.msrb.mxu1 %v955_v24  ;;  %v40_v20 = vperm.slane %v37_v10, 1  ;;  %v1220_v24 = vld [vmem:[%s1845_s3 + $0x104] sm:$0xf]  ;;  %v1059_v18 = vor.u32 %v1236_v28, %v1056_v29  ;;  %v1257_v52 = vld [vmem:[%s1847_s5 + $0x28] sm:$0xff]  ;;  %v1255_v54 = vld [vmem:[%s1847_s5 + $0x18] sm:$0xff]  ;;  %s813_s24 = sshll.u32 %s1296_s23, 4  ;;  %s814_s24 = int_to_ptr.vmem [resolvable:$true] %s813_s24 }
  0x3f   :  { %v995_v32 = vor.u32 %v1220_v24, %v992_v25  ;;  %v1267_v55 = vld [vmem:[%s1847_s5 + $0x78] sm:$0xff]  ;;  %v1266_v57 = vld [vmem:[%s1847_s5 + $0x70] sm:$0xff]  ;;  %v1253_v58 = vld [vmem:[%s1847_s5 + $0x8] sm:$0xff] }
  0x40   :  { %622 = vmatpush.bf16.msrb.mxu2 %v1027_v61  ;;  %v1265_v59 = vld [vmem:[%s1847_s5 + $0x68] sm:$0xff]  ;;  %v1264_v61 = vld [vmem:[%s1847_s5 + $0x60] sm:$0xff]  ;;  %v1263_v62 = vld [vmem:[%s1847_s5 + $0x58] sm:$0xff] }
  0x41   :  { %635 = vmatpush.bf16.msrb.mxu3 %v1091_v0  ;;  %v1262_v1 = vld [vmem:[%s1847_s5 + $0x50] sm:$0xff]  ;;  %v1261_v2 = vld [vmem:[%s1847_s5 + $0x48] sm:$0xff]  ;;  %v215_v5 = vld [vmem:[%s1846_s4] sm:$0x3] }
  0x42   :  { %598 = vmatpush.bf16.msrb.mxu0 %v883_v33  ;;  %611 = vmatpush.bf16.msrb.mxu1 %v947_v36  ;;  %v217_v7 = vperm.slane %v215_v5, 0 }
  0x44   :  { %623 = vmatpush.bf16.msrb.mxu2 %v1019_v4 }
  0x45   :  { %636 = vmatpush.bf16.msrb.mxu3 %v1083_v6  ;;  %v1260_v6 = vld [vmem:[%s1847_s5 + $0x40] sm:$0xff] }
  0x46   :  { %599 = vmatpush.bf16.msrb.mxu0 %v875_v44  ;;  %612 = vmatpush.bf16.msrb.mxu1 %v939_v48 }
  0x48   :  { %624 = vmatpush.bf16.msrb.mxu2 %v1011_v12 }
  0x49   :  { %637 = vmatpush.bf16.msrb.mxu3 %v1075_v13 }
  0x4a   :  { %600 = vmatpush.bf16.msrb.mxu0 %v867_v56  ;;  %613 = vmatpush.bf16.msrb.mxu1 %v931_v60  ;;  %v1254_v56 = vld [vmem:[%s1847_s5 + $0x10] sm:$0xff]  ;;  %v1252_v60 = vld [vmem:[%s1847_s5] sm:$0xff] }
  0x4c   :  { %625 = vmatpush.bf16.msrb.mxu2 %v1003_v21 }
  0x4d   :  { %638 = vmatpush.bf16.msrb.mxu3 %v1067_v22 }
  0x50   :  { %626 = vmatpush.bf16.msrb.mxu2 %v995_v32 }
  0x51   :  { %639 = vmatpush.bf16.msrb.mxu3 %v1059_v18 }
  0x8e   :  { %v100_v23 = vpop.f32.mrf.mxu2 }
  0x8f   :  { %v101_v26 = vadd.f32 %v100_v23, %v39_v19  ;;  %v113_v27 = vpop.f32.mrf.mxu3 }
  0x90   :  { %v114_v30 = vadd.f32 %v113_v27, %v40_v20  ;;  %v218_v20 = vperm.slane %v215_v5, 1 }
  0x91   :  { %v143_v31 = vmax.f32 %v101_v26, 0.0 }
  0x92   :  { %v144_v33 = vmax.f32 %v114_v30, 0.0 }
  0x93   :  { %v147_v34 = vpack.c.bf16 %v143_v31, %v143_v31 }
  0x94   :  { %v148_v35 = vpack.c.bf16 %v144_v33, %v144_v33 }
  0x95   :  { %549 = vmatmul.bf16.vlgmr.msra.gmra.mxu0 %v147_v34 }
  0x96   :  { %562 = vmatmul.bf16.vlgmr.msra.gmra.mxu1 %v148_v35  ;;  %v102_v36 = vpop.f32.mrf.mxu2  ;;  %781 = vmatpush.bf16.msra.mxu0 %v1259_v50 }
  0x97   :  { %v115_v37 = vpop.f32.mrf.mxu3  ;;  %794 = vmatpush.bf16.msra.mxu1 %v1267_v55 }
  0x9a   :  { %782 = vmatpush.bf16.msra.mxu0 %v1258_v51 }
  0x9b   :  { %795 = vmatpush.bf16.msra.mxu1 %v1266_v57 }
  0x9e   :  { %v126_v40 = vpop.f32.mrf.mxu2  ;;  %783 = vmatpush.bf16.msra.mxu0 %v1257_v52 }
  0x9f   :  { %v127_v41 = vadd.f32 %v126_v40, %v41_v38  ;;  %v139_v42 = vpop.f32.mrf.mxu3  ;;  %796 = vmatpush.bf16.msra.mxu1 %v1265_v59 }
  0xa0   :  { %v140_v43 = vadd.f32 %v139_v42, %v42_v39 }
  0xa1   :  { %v145_v44 = vmax.f32 %v127_v41, 0.0 }
  0xa2   :  { %v146_v45 = vmax.f32 %v140_v43, 0.0  ;;  %784 = vmatpush.bf16.msra.mxu0 %v1256_v53 }
  0xa3   :  { %v149_v46 = vpack.c.bf16 %v145_v44, %v145_v44  ;;  %797 = vmatpush.bf16.msra.mxu1 %v1264_v61 }
  0xa4   :  { %v150_v47 = vpack.c.bf16 %v146_v45, %v146_v45 }
  0xa5   :  { %575 = vmatmul.bf16.vlgmr.msra.gmra.mxu2 %v149_v46  ;;  %601 = vmatmul.bf16.vlgmr.msrb.gmra.mxu0 %v147_v34 }
  0xa6   :  { %588 = vmatmul.bf16.vlgmr.msra.gmra.mxu3 %v150_v47  ;;  %614 = vmatmul.bf16.vlgmr.msrb.gmra.mxu1 %v148_v35  ;;  %v128_v48 = vpop.f32.mrf.mxu2  ;;  %v1269_v35 = vld [vmem:[%s1848_s6] ss:$0 sm:$0xff] }
  0xa7   :  { %v141_v49 = vpop.f32.mrf.mxu3  ;;  %785 = vmatpush.bf16.msra.mxu0 %v1255_v54  ;;  %798 = vmatpush.bf16.msra.mxu1 %v1263_v62 }
  0xab   :  { %786 = vmatpush.bf16.msra.mxu0 %v1254_v56  ;;  %799 = vmatpush.bf16.msra.mxu1 %v1262_v1 }
  0xaf   :  { %787 = vmatpush.bf16.msra.mxu0 %v1253_v58  ;;  %800 = vmatpush.bf16.msra.mxu1 %v1261_v2 }
  0xb3   :  { %788 = vmatpush.bf16.msra.mxu0 %v1252_v60  ;;  %801 = vmatpush.bf16.msra.mxu1 %v1260_v6 }
  0xb5   :  { %627 = vmatmul.bf16.vlgmr.msrb.gmra.mxu2 %v149_v46 }
  0xb6   :  { %640 = vmatmul.bf16.vlgmr.msrb.gmra.mxu3 %v150_v47 }
 0x112   :  { %v550_v63 = vpop.f32.mrf.mxu0 }
 0x113   :  { %v563_v0 = vpop.f32.mrf.mxu1  ;;  %v551_v9 = vadd.f32 %v550_v63, %v217_v7 }
 0x115   :  { %v564_v11 = vadd.f32 %v563_v0, %v551_v9 }
 0x11a   :  { %v552_v3 = vpop.f32.mrf.mxu0 }
 0x11b   :  { %v565_v4 = vpop.f32.mrf.mxu1 }
 0x122   :  { %v602_v8 = vpop.f32.mrf.mxu0 }
 0x123   :  { %v615_v10 = vpop.f32.mrf.mxu1  ;;  %v603_v24 = vadd.f32 %v602_v8, %v218_v20 }
 0x125   :  { %v616_v25 = vadd.f32 %v615_v10, %v603_v24 }
 0x128   :  { %v576_v12 = vpop.f32.mrf.mxu2 }
 0x129   :  { %v577_v13 = vadd.f32 %v576_v12, %v564_v11  ;;  %v589_v14 = vpop.f32.mrf.mxu3 }
 0x12a   :  { %v604_v15 = vpop.f32.mrf.mxu0 }
 0x12b   :  { %v590_v16 = vadd.f32 %v589_v14, %v577_v13  ;;  %v617_v17 = vpop.f32.mrf.mxu1 }
 0x12d   :  { %v645_v19 = vmax.f32 %v590_v16, 0.0 }
 0x12f   :  { %v647_v21 = vpack.c.bf16 %v645_v19, %v645_v19 }
 0x130   :  { %v578_v22 = vpop.f32.mrf.mxu2 }
 0x131   :  { %v591_v23 = vpop.f32.mrf.mxu3  ;;  %789 = vmatmul.bf16.vlgmr.msra.gmra.mxu0 %v647_v21 }
 0x138   :  { %v628_v26 = vpop.f32.mrf.mxu2 }
 0x139   :  { %v629_v27 = vadd.f32 %v628_v26, %v616_v25  ;;  %v641_v28 = vpop.f32.mrf.mxu3 }
 0x13b   :  { %v642_v29 = vadd.f32 %v641_v28, %v629_v27 }
 0x13d   :  { %v646_v30 = vmax.f32 %v642_v29, 0.0 }
 0x13f   :  { %v648_v31 = vpack.c.bf16 %v646_v30, %v646_v30 }
 0x140   :  { %v630_v32 = vpop.f32.mrf.mxu2 }
 0x141   :  { %v643_v33 = vpop.f32.mrf.mxu3  ;;  %802 = vmatmul.bf16.vlgmr.msra.gmra.mxu1 %v648_v31 }
 0x1ae   :  { %v790_v18 = vpop.f32.mrf.mxu0 }
 0x1af   :  { %v791_v36 = vadd.f32 %v1269_v35, %v790_v18 }
 0x1b6   :  { %v792_v34 = vpop.f32.mrf.mxu0 }
 0x1be   :  { %v803_v37 = vpop.f32.mrf.mxu1 }
 0x1bf   :  { %v804_v38 = vadd.f32 %v803_v37, %v791_v36 }
 0x1c1   :  { %807 = vst [vmem:[#allocation2] sm:$0xff] %v804_v38 }
 0x1c2   :  { %818 = dma.vmem_to_hbm [thread:$0]  %s814_s24, 128, %s816_s27, [#allocation3]  }
 0x1c6   :  { %v805_v39 = vpop.f32.mrf.mxu1 }
 0x1c7   :  { %1294 = dma.done.wait [#allocation3], 128  }
 0x1c8   :  { %1295 = vsyncadd [#allocation3], 4294967168 }
 0x1c9   :  { %823 = vsyncpa [#allocation3], 1 }

</bundles_post_ra>
